<compile_context>
chip_gen: v6e
topology: v6e:2x2x1
jax: 0.10.0
libtpu: 0.0.40
codegen_flags: <defaults>
</compile_context>

<pallas_src>
import jax
import jax.numpy as jnp
from jax.experimental import pallas as pl
from jax.experimental.pallas import tpu as pltpu

HID1 = 60
HID2 = 60
N_OUT = 1

HID_PAD = 128     # hidden width padded to one full lane tile
SUBLANE = 8
N_OUT_PAD = 16    # head weight stored as (16, 128): row 0 real, rows 1..15 zero
                  # (16 = bf16 native sublane tile, keeps the NT matmul aligned)


def _round_up(x, m):
    return (x + m - 1) // m * m


def value_nn_kernel(x_ref, w1_ref, b1_ref, w2_ref, b2_ref, w3_ref, b3_ref, o_ref):
    # x_ref : (TB, n_in_pad)   bf16   (pipelined per grid step)
    # w1    : (n_in_pad, 128)  bf16   (resident)
    # b1/b2 : (1, 128)         f32    (resident)
    # w2    : (128, 128)       bf16   (resident)
    # w3    : (16, 128)        bf16   (resident; row 0 = head weights)
    # b3    : (1, 1)           f32    (SMEM scalar)
    # o_ref : (1, TB)          f32    (batch on lanes -> lane-dense stores)
    x = x_ref[...]

    h1 = jnp.dot(x, w1_ref[...], preferred_element_type=jnp.float32) + b1_ref[...]
    h1 = jnp.maximum(h1, 0.0).astype(x.dtype)

    h2 = jnp.dot(h1, w2_ref[...], preferred_element_type=jnp.float32) + b2_ref[...]
    h2 = jnp.maximum(h2, 0.0).astype(x.dtype)

    # Head layer as an NT dot (contract the 128-wide hidden dim of both
    # operands): result (16, TB) has batch on lanes; only row 0 is meaningful.
    head = jax.lax.dot_general(
        w3_ref[...], h2, (((1,), (1,)), ((), ())),
        preferred_element_type=jnp.float32)          # (16, TB) f32

    o_ref[...] = head[0:1, :] + b3_ref[0, 0]         # (1, TB), full-lane store


def value_nn_forward(x, packed, *, tb_max=1024, compute_dtype=jnp.bfloat16):
    """x: (B, n_in) float32. packed: dict from pack_params(). Returns (B, 1) f32."""
    B, n_in = x.shape
    n_in_pad = packed["w1"].shape[0]

    # Batch tile: multiple of 256, at most tb_max, at least covering small B.
    tb = min(int(tb_max), _round_up(max(B, 1), 256))
    tb = _round_up(tb, 256)
    b_pad = _round_up(B, tb)
    num_tiles = b_pad // tb

    x_p = jnp.pad(x, ((0, b_pad - B), (0, n_in_pad - n_in))).astype(compute_dtype)

    def resident(shape):
        return pl.BlockSpec(shape, lambda i: (0, 0))

    out = pl.pallas_call(
        value_nn_kernel,
        out_shape=jax.ShapeDtypeStruct((1, b_pad), jnp.float32),
        grid=(num_tiles,),
        in_specs=[
            pl.BlockSpec((tb, n_in_pad), lambda i: (i, 0)),     # x tile (pipelined)
            resident((n_in_pad, HID_PAD)),                      # w1
            resident((1, HID_PAD)),                             # b1
            resident((HID_PAD, HID_PAD)),                       # w2
            resident((1, HID_PAD)),                             # b2
            resident((N_OUT_PAD, HID_PAD)),                     # w3
            pl.BlockSpec((1, 1), lambda i: (0, 0),
                         memory_space=pltpu.MemorySpace.SMEM),  # b3 scalar
        ],
        out_specs=pl.BlockSpec((1, tb), lambda i: (0, i)),      # lane-dense row
        compiler_params=pltpu.CompilerParams(
            dimension_semantics=("parallel",),        # v7x: shard tiles over 2 TCs
            vmem_limit_bytes=32 * 1024 * 1024,        # past v5e's 16 MiB default
        ),
    )(x_p, packed["w1"], packed["b1"], packed["w2"], packed["b2"],
      packed["w3"], packed["b3"])

    return out[0, :B, None]                                     # (B, 1)


def init_params(key, n_in):
    """PyTorch nn.Linear default init (U[-1/sqrt(fan_in), 1/sqrt(fan_in)]).

    Logical shapes, weights stored transposed vs. PyTorch (in_features, out_features).
    """
    ks = jax.random.split(key, 6)

    def linear(kw, kb, fan_in, fan_out):
        bound = 1.0 / jnp.sqrt(jnp.float32(fan_in))
        w = jax.random.uniform(kw, (fan_in, fan_out), jnp.float32, -bound, bound)
        b = jax.random.uniform(kb, (fan_out,), jnp.float32, -bound, bound)
        return w, b

    w1, b1 = linear(ks[0], ks[1], n_in, HID1)
    w2, b2 = linear(ks[2], ks[3], HID1, HID2)
    w3, b3 = linear(ks[4], ks[5], HID2, N_OUT)
    return {"w1": w1, "b1": b1, "w2": w2, "b2": b2, "w3": w3, "b3": b3}


def pack_params(p, *, compute_dtype=jnp.bfloat16):
    """Zero-pad logical params to the (8,128)-aligned kernel layout (inert padding)."""
    n_in = p["w1"].shape[0]
    n_in_pad = _round_up(n_in, SUBLANE)
    w1 = jnp.zeros((n_in_pad, HID_PAD), jnp.float32).at[:n_in, :HID1].set(p["w1"])
    b1 = jnp.zeros((1, HID_PAD), jnp.float32).at[0, :HID1].set(p["b1"])
    w2 = jnp.zeros((HID_PAD, HID_PAD), jnp.float32).at[:HID1, :HID2].set(p["w2"])
    b2 = jnp.zeros((1, HID_PAD), jnp.float32).at[0, :HID2].set(p["b2"])
    w3 = jnp.zeros((N_OUT_PAD, HID_PAD), jnp.float32).at[0, :HID2].set(p["w3"][:, 0])
    b3 = p["b3"].reshape(1, 1).astype(jnp.float32)
    return {
        "w1": w1.astype(compute_dtype), "b1": b1,
        "w2": w2.astype(compute_dtype), "b2": b2,
        "w3": w3.astype(compute_dtype), "b3": b3,
    }


def reference_forward(x, p, *, compute_dtype=jnp.bfloat16):
    """Pure-JAX reference mirroring the kernel's bf16-in / f32-accumulate precision."""
    cd = compute_dtype
    h1 = jnp.maximum(
        jnp.dot(x.astype(cd), p["w1"].astype(cd),
                preferred_element_type=jnp.float32) + p["b1"], 0.0)
    h2 = jnp.maximum(
        jnp.dot(h1.astype(cd), p["w2"].astype(cd),
                preferred_element_type=jnp.float32) + p["b2"], 0.0)
    return jnp.dot(h2.astype(cd), p["w3"].astype(cd),
                   preferred_element_type=jnp.float32) + p["b3"]


if __name__ == "__main__":
    key = jax.random.PRNGKey(0)
    k_x, k_p = jax.random.split(key)

    B, N_IN = 8, 32                       # small batch of flat state vectors
    x = jax.random.normal(k_x, (B, N_IN), jnp.float32)
    params = init_params(k_p, N_IN)
    packed = pack_params(params)

    out = jax.block_until_ready(value_nn_forward(x, packed))
    ref = reference_forward(x, params)

    assert out.shape == (B, N_OUT)
    assert jnp.allclose(out, ref, atol=1e-2, rtol=1e-2), (out, ref)

    print("KERNEL_OK")
</pallas_src>

<mosaic_0001>
module attributes {stable_mosaic.version = 11 : i64} {
  func.func @value_nn_kernel(%arg0: i32, %arg1: memref<256x32xbf16, #tpu.memory_space<vmem>>, %arg2: memref<32x128xbf16, #tpu.memory_space<vmem>>, %arg3: memref<1x128xf32, #tpu.memory_space<vmem>>, %arg4: memref<128x128xbf16, #tpu.memory_space<vmem>>, %arg5: memref<1x128xf32, #tpu.memory_space<vmem>>, %arg6: memref<16x128xbf16, #tpu.memory_space<vmem>>, %arg7: memref<1x1xf32, #tpu.memory_space<smem>>, %arg8: memref<1x256xf32, #tpu.memory_space<vmem>>) attributes {dimension_semantics = [#tpu.dimension_semantics<parallel>], iteration_bounds = array<i64: 1>, scalar_prefetch = 0 : i64, scratch_operands = 0 : i64, tpu.core_type = #tpu.core_type<tc>, window_params = [{transform_indices = @transform_0, window_bounds = array<i64: 256, 32>}, {pipeline_mode = #tpu.pipeline_mode<synchronous>, transform_indices = @transform_1, window_bounds = array<i64: 32, 128>}, {pipeline_mode = #tpu.pipeline_mode<synchronous>, transform_indices = @transform_2, window_bounds = array<i64: 1, 128>}, {pipeline_mode = #tpu.pipeline_mode<synchronous>, transform_indices = @transform_3, window_bounds = array<i64: 128, 128>}, {pipeline_mode = #tpu.pipeline_mode<synchronous>, transform_indices = @transform_4, window_bounds = array<i64: 1, 128>}, {pipeline_mode = #tpu.pipeline_mode<synchronous>, transform_indices = @transform_5, window_bounds = array<i64: 16, 128>}, {transform_indices = @transform_6, window_bounds = array<i64: 1, 1>}, {transform_indices = @transform_7, window_bounds = array<i64: 1, 256>}]} {
    %c0 = arith.constant 0 : index
    %c0_0 = arith.constant 0 : index
    %0 = vector.load %arg1[%c0, %c0_0] : memref<256x32xbf16, #tpu.memory_space<vmem>>, vector<256x32xbf16>
    %c0_1 = arith.constant 0 : index
    %c0_2 = arith.constant 0 : index
    %1 = vector.load %arg2[%c0_1, %c0_2] : memref<32x128xbf16, #tpu.memory_space<vmem>>, vector<32x128xbf16>
    %cst = arith.constant dense<0.000000e+00> : vector<256x128xf32>
    %2 = tpu.matmul %0, %1, %cst {dimension_numbers = #tpu.dot_dimension_numbers<[1], [0], [0], [1], [0, 0, 1, 1], [], []>} : vector<256x32xbf16>, vector<32x128xbf16>, vector<256x128xf32> -> vector<256x128xf32>
    %c0_3 = arith.constant 0 : index
    %c0_4 = arith.constant 0 : index
    %3 = vector.load %arg3[%c0_3, %c0_4] : memref<1x128xf32, #tpu.memory_space<vmem>>, vector<1x128xf32>
    %4 = vector.broadcast %3 : vector<1x128xf32> to vector<256x128xf32>
    %5 = arith.addf %2, %4 : vector<256x128xf32>
    %cst_5 = arith.constant 0.000000e+00 : f32
    %6 = vector.broadcast %cst_5 : f32 to vector<256x128xf32>
    %7 = arith.maximumf %5, %6 : vector<256x128xf32>
    %8 = arith.truncf %7 : vector<256x128xf32> to vector<256x128xbf16>
    %c0_6 = arith.constant 0 : index
    %c0_7 = arith.constant 0 : index
    %9 = vector.load %arg4[%c0_6, %c0_7] : memref<128x128xbf16, #tpu.memory_space<vmem>>, vector<128x128xbf16>
    %cst_8 = arith.constant dense<0.000000e+00> : vector<256x128xf32>
    %10 = tpu.matmul %8, %9, %cst_8 {dimension_numbers = #tpu.dot_dimension_numbers<[1], [0], [0], [1], [0, 0, 1, 1], [], []>} : vector<256x128xbf16>, vector<128x128xbf16>, vector<256x128xf32> -> vector<256x128xf32>
    %c0_9 = arith.constant 0 : index
    %c0_10 = arith.constant 0 : index
    %11 = vector.load %arg5[%c0_9, %c0_10] : memref<1x128xf32, #tpu.memory_space<vmem>>, vector<1x128xf32>
    %12 = vector.broadcast %11 : vector<1x128xf32> to vector<256x128xf32>
    %13 = arith.addf %10, %12 : vector<256x128xf32>
    %cst_11 = arith.constant 0.000000e+00 : f32
    %14 = vector.broadcast %cst_11 : f32 to vector<256x128xf32>
    %15 = arith.maximumf %13, %14 : vector<256x128xf32>
    %16 = arith.truncf %15 : vector<256x128xf32> to vector<256x128xbf16>
    %c0_12 = arith.constant 0 : index
    %c0_13 = arith.constant 0 : index
    %17 = vector.load %arg6[%c0_12, %c0_13] : memref<16x128xbf16, #tpu.memory_space<vmem>>, vector<16x128xbf16>
    %cst_14 = arith.constant dense<0.000000e+00> : vector<16x256xf32>
    %18 = tpu.matmul %17, %16, %cst_14 {dimension_numbers = #tpu.dot_dimension_numbers<[1], [1], [0], [0], [0, 0, 1, 0], [], []>} : vector<16x128xbf16>, vector<256x128xbf16>, vector<16x256xf32> -> vector<16x256xf32>
    %19 = vector.extract_strided_slice %18 {offsets = [0, 0], sizes = [1, 256], strides = [1, 1]} : vector<16x256xf32> to vector<1x256xf32>
    %c0_15 = arith.constant 0 : index
    %c0_16 = arith.constant 0 : index
    %20 = memref.load %arg7[%c0_15, %c0_16] : memref<1x1xf32, #tpu.memory_space<smem>>
    %21 = vector.broadcast %20 : f32 to vector<1x256xf32>
    %22 = arith.addf %19, %21 : vector<1x256xf32>
    %c0_17 = arith.constant 0 : index
    %c0_18 = arith.constant 0 : index
    %23 = vector.load %arg8[%c0_17, %c0_18] : memref<1x256xf32, #tpu.memory_space<vmem>>, vector<1x256xf32>
    tpu.vector_store %arg8[%c0_17, %c0_18], %22 {strides = array<i32>} : memref<1x256xf32, #tpu.memory_space<vmem>>, vector<1x256xf32>,
    return
  }
  func.func @transform_0(%arg0: i32) -> (i32, i32) {
    %c0_i32 = arith.constant 0 : i32
    %c0_i32_0 = arith.constant 0 : i32
    return %arg0, %c0_i32 : i32, i32
  }
  func.func @transform_1(%arg0: i32) -> (i32, i32) {
    %c0_i32 = arith.constant 0 : i32
    %c0_i32_0 = arith.constant 0 : i32
    %c0_i32_1 = arith.constant 0 : i32
    return %c0_i32, %c0_i32_0 : i32, i32
  }
  func.func @transform_2(%arg0: i32) -> (i32, i32) {
    %c0_i32 = arith.constant 0 : i32
    %c0_i32_0 = arith.constant 0 : i32
    %c0_i32_1 = arith.constant 0 : i32
    return %c0_i32, %c0_i32_0 : i32, i32
  }
  func.func @transform_3(%arg0: i32) -> (i32, i32) {
    %c0_i32 = arith.constant 0 : i32
    %c0_i32_0 = arith.constant 0 : i32
    %c0_i32_1 = arith.constant 0 : i32
    return %c0_i32, %c0_i32_0 : i32, i32
  }
  func.func @transform_4(%arg0: i32) -> (i32, i32) {
    %c0_i32 = arith.constant 0 : i32
    %c0_i32_0 = arith.constant 0 : i32
    %c0_i32_1 = arith.constant 0 : i32
    return %c0_i32, %c0_i32_0 : i32, i32
  }
  func.func @transform_5(%arg0: i32) -> (i32, i32) {
    %c0_i32 = arith.constant 0 : i32
    %c0_i32_0 = arith.constant 0 : i32
    %c0_i32_1 = arith.constant 0 : i32
    return %c0_i32, %c0_i32_0 : i32, i32
  }
  func.func @transform_6(%arg0: i32) -> (i32, i32) {
    %c0_i32 = arith.constant 0 : i32
    %c0_i32_0 = arith.constant 0 : i32
    %c0_i32_1 = arith.constant 0 : i32
    return %c0_i32, %c0_i32_0 : i32, i32
  }
  func.func @transform_7(%arg0: i32) -> (i32, i32) {
    %c0_i32 = arith.constant 0 : i32
    %c0_i32_0 = arith.constant 0 : i32
    return %c0_i32, %arg0 : i32, i32
  }
}

</mosaic_0001>

<bundles_post_ra>
// kernel: tpu_custom_call.1
= control target key start
LH: loop header
LB: loop body
LE: loop exit
PB: predicated region body
PF: predicated region fallthrough
CT: control target
= control target key end

     0   :  { %vm164_vm0 = vcmask 261120   ;;  %s1285_s0 = inlined_call_operand.vmem [shape: bf16[256,32], index: 0, kind: input, shape index: {}]   ;;  %s1286_s1 = inlined_call_operand.vmem [shape: bf16[32,128], index: 1, kind: input, shape index: {}]   ;;  %s1287_s2 = inlined_call_operand.vmem [shape: f32[1,128], index: 2, kind: input, shape index: {}]   ;;  %s1288_s3 = inlined_call_operand.vmem [shape: bf16[128,128], index: 3, kind: input, shape index: {}]   ;;  %s1289_s4 = inlined_call_operand.vmem [shape: f32[1,128], index: 4, kind: input, shape index: {}]   ;;  %s1290_s5 = inlined_call_operand.vmem [shape: bf16[16,128], index: 5, kind: input, shape index: {}]   ;;  %s1291_s6 = inlined_call_operand.<no memory space> [shape: f32[1,1], index: 6, kind: input, shape index: {}]   ;;  %s1292_s7 = inlined_call_operand.hbm [shape: f32[1,256], index: 7, kind: output, shape index: {}]  }
   0x1   :  { %v983_v0 = vld [vmem:[%s1286_s1 + $0x8] sm:$0xff]   ;;  %v984_v1 = vld [vmem:[%s1286_s1] sm:$0xff]   ;;  %v987_v4 = vld [vmem:[%s1285_s0 + $0x10] sm:$0xff]  }
   0x2   :  { %897 = vmatprep.subr.bf16.mxu0 %v983_v0  ;;  %v985_v2 = vld [vmem:[%s1285_s0] sm:$0xff]   ;;  %v986_v3 = vld [vmem:[%s1285_s0 + $0x8] sm:$0xff]   ;;  %v988_v5 = vld [vmem:[%s1285_s0 + $0x18] sm:$0xff]  }
   0x3   :  { %898 = vmatpush3.bf16.msra.mxu0 %v983_v0  ;;  %901 = vmatprep.mubr.msk.bf16.mxu0 %vm164_vm0, %v985_v2  ;;  %v989_v6 = vld [vmem:[%s1285_s0 + $0x20] sm:$0xff]   ;;  %v1001_v7 = vld [vmem:[%s1288_s3 + $0x38] sm:$0xff]   ;;  %v1002_v8 = vld [vmem:[%s1288_s3 + $0x30] sm:$0xff]  }
   0x4   :  { %899 = vmatprep.subr.bf16.mxu0 %v984_v1  ;;  %v990_v9 = vld [vmem:[%s1285_s0 + $0x28] sm:$0xff]   ;;  %933 = vmatprep.subr.bf16.mxu1 %v1001_v7  ;;  %v991_v10 = vld [vmem:[%s1285_s0 + $0x30] sm:$0xff]  }
   0x5   :  { %934 = vmatpush3.bf16.msra.mxu1 %v1001_v7  ;;  %v1003_v11 = vld [vmem:[%s1288_s3 + $0x28] sm:$0xff]  }
   0x6   :  { %935 = vmatprep.subr.bf16.mxu1 %v1002_v8 }
   0x7   :  { %900 = vmatpush3.bf16.msra.mxu0 %v984_v1 }
   0x9   :  { %936 = vmatpush3.bf16.msra.mxu1 %v1002_v8 }
   0xa   :  { %902 = vmatmul.mubr.msk.bf16.vlgmr.msra.gmra.mxu0 %vm164_vm0, %v986_v3 }
   0xb   :  { %905 = vmatprep.mubr.msk.bf16.mxu0 %vm164_vm0, %v987_v4 }
  0x12   :  { %906 = vmatmul.mubr.msk.bf16.gmra.mxu0 %vm164_vm0, %v988_v5 }
  0x13   :  { %909 = vmatprep.mubr.msk.bf16.mxu0 %vm164_vm0, %v989_v6 }
  0x14   :  { %13 = vsyncpa [#allocation4], 0  ;;  %937 = vmatprep.subr.bf16.mxu1 %v1003_v11  ;;  %v1004_v12 = vld [vmem:[%s1288_s3 + $0x20] sm:$0xff]   ;;  %v992_v13 = vld [vmem:[%s1285_s0 + $0x38] sm:$0xff]   ;;  %s1033_s8 = smov [#allocation3]  }
  0x15   :  { %938 = vmatpush3.bf16.msra.mxu1 %v1003_v11  ;;  %v1005_v14 = vld [vmem:[%s1288_s3 + $0x18] sm:$0xff]   ;;  %v993_v15 = vld [vmem:[%s1285_s0 + $0x40] sm:$0xff]   ;;  %v994_v16 = vld [vmem:[%s1285_s0 + $0x48] sm:$0xff]   ;;  %s784_s9 = sshll.u32 %s1033_s8, 4  ;;  %s785_s9 = int_to_ptr.vmem [resolvable:$true] %s784_s9 }
  0x16   :  { %939 = vmatprep.subr.bf16.mxu1 %v1004_v12  ;;  %v995_v17 = vld [vmem:[%s1285_s0 + $0x50] sm:$0xff]   ;;  %v996_v18 = vld [vmem:[%s1285_s0 + $0x58] sm:$0xff]   ;;  %v997_v19 = vld [vmem:[%s1285_s0 + $0x60] sm:$0xff]   ;;  %s1010_s10 = scalar_lea.vmem %s785_s9, 32  ;;  %p1015_p1 = scmp.lt.s32.totalorder %s785_s9, %s785_s9 }
  0x17   :  { %v998_v20 = vld [vmem:[%s1285_s0 + $0x68] sm:$0xff]   ;;  %v999_v21 = vld [vmem:[%s1285_s0 + $0x70] sm:$0xff]   ;;  %v1000_v22 = vld [vmem:[%s1285_s0 + $0x78] sm:$0xff]   ;;  %p1011_p0 = scmp.ne.s32.totalorder %s785_s9, %s1010_s10  ;;  %p1016_p2 = scmp.lt.s32.totalorder %s1010_s10, %s1010_s10 }
  0x18   :  { %v1006_v23 = vld [vmem:[%s1288_s3 + $0x10] sm:$0xff]   ;;  %v1007_v24 = vld [vmem:[%s1288_s3 + $0x8] sm:$0xff]   ;;  %v1008_v25 = vld [vmem:[%s1288_s3] sm:$0xff]  }
  0x19   :  { %940 = vmatpush3.bf16.msra.mxu1 %v1004_v12  ;;  %v1171_v28 = vld [vmem:[%s1287_s2] ss:$0 sm:$0xff]  ;;  %p1017_p3 = por %p1016_p2, %p1015_p1 }
  0x1a   :  { %910 = vmatmul.mubr.msk.bf16.gmra.mxu0 %vm164_vm0, %v990_v9  ;;  %941 = vmatprep.subr.bf16.mxu1 %v1005_v14 }
  0x1b   :  { %913 = vmatprep.mubr.msk.bf16.mxu0 %vm164_vm0, %v991_v10  ;;  %p1018_p4 = pnand %p1017_p3, %p1011_p0 }
  0x1d   :  { %942 = vmatpush3.bf16.msra.mxu1 %v1005_v14 }
  0x1e   :  { %943 = vmatprep.subr.bf16.mxu1 %v1006_v23 }
  0x21   :  { %944 = vmatpush3.bf16.msra.mxu1 %v1006_v23 }
  0x22   :  { %914 = vmatmul.mubr.msk.bf16.gmra.mxu0 %vm164_vm0, %v992_v13  ;;  %945 = vmatprep.subr.bf16.mxu1 %v1007_v24 }
  0x23   :  { %917 = vmatprep.mubr.msk.bf16.mxu0 %vm164_vm0, %v993_v15 }
  0x25   :  { %946 = vmatpush3.bf16.msra.mxu1 %v1007_v24 }
  0x26   :  { %947 = vmatprep.subr.bf16.mxu1 %v1008_v25 }
  0x29   :  { %948 = vmatpush3.bf16.msra.mxu1 %v1008_v25 }
  0x2a   :  { %918 = vmatmul.mubr.msk.bf16.gmra.mxu0 %vm164_vm0, %v994_v16 }
  0x2b   :  { %921 = vmatprep.mubr.msk.bf16.mxu0 %vm164_vm0, %v995_v17 }
  0x32   :  { %922 = vmatmul.mubr.msk.bf16.gmra.mxu0 %vm164_vm0, %v996_v18 }
  0x33   :  { %925 = vmatprep.mubr.msk.bf16.mxu0 %vm164_vm0, %v997_v19 }
  0x3a   :  { %926 = vmatmul.mubr.msk.bf16.gmra.mxu0 %vm164_vm0, %v998_v20 }
  0x3b   :  { %929 = vmatprep.mubr.msk.bf16.mxu0 %vm164_vm0, %v999_v21 }
  0x42   :  { %930 = vmatmul.mubr.msk.bf16.gmra.mxu0 %vm164_vm0, %v1000_v22 }
  0xca   :  { %v903_v26 = vpop.f32.mrf.mxu0 }
  0xcb   :  { %v256_v32 = vadd.f32 %v903_v26, %v1171_v28 }
  0xcc   :  { %v247_v27 = vpop.f32.mrf.mxu0 }
  0xcd   :  { %v248_v30 = vadd.f32 %v1171_v28, %v247_v27  ;;  %v376_v39 = vmax.f32 %v256_v32, 0.0 }
  0xce   :  { %v904_v29 = vpop.f32.mrf.mxu0 }
  0xcf   :  { %v259_v31 = vadd.f32 %v904_v29, %v1171_v28  ;;  %v374_v37 = vmax.f32 %v248_v30, 0.0 }
  0xd0   :  { %v250_v33 = vpop.f32.mrf.mxu0 }
  0xd1   :  { %v251_v34 = vadd.f32 %v1171_v28, %v250_v33  ;;  %v377_v35 = vmax.f32 %v259_v31, 0.0 }
  0xd2   :  { %v907_v36 = vpop.f32.mrf.mxu0 }
  0xd3   :  { %v375_v38 = vmax.f32 %v251_v34, 0.0  ;;  %v407_v42 = vpack.c.bf16 %v377_v35, %v376_v39  ;;  %v272_v46 = vadd.f32 %v907_v36, %v1171_v28 }
  0xd4   :  { %v263_v40 = vpop.f32.mrf.mxu0 }
  0xd5   :  { %v406_v41 = vpack.c.bf16 %v375_v38, %v374_v37  ;;  %v264_v44 = vadd.f32 %v1171_v28, %v263_v40  ;;  %v380_v53 = vmax.f32 %v272_v46, 0.0 }
  0xd6   :  { %v908_v43 = vpop.f32.mrf.mxu0 }
  0xd7   :  { %v275_v45 = vadd.f32 %v908_v43, %v1171_v28  ;;  %949 = vmatprep.mubr.bf16.mxu1 %v406_v41  ;;  %v378_v51 = vmax.f32 %v264_v44, 0.0 }
  0xd8   :  { %v266_v47 = vpop.f32.mrf.mxu0  ;;  %950 = vmatmul.mubr.bf16.vlgmr.msra.gmra.mxu1 %v407_v42 }
  0xd9   :  { %v267_v48 = vadd.f32 %v1171_v28, %v266_v47  ;;  %v381_v49 = vmax.f32 %v275_v45, 0.0 }
  0xda   :  { %v911_v50 = vpop.f32.mrf.mxu0 }
  0xdb   :  { %v379_v52 = vmax.f32 %v267_v48, 0.0  ;;  %v409_v56 = vpack.c.bf16 %v381_v49, %v380_v53  ;;  %v288_v60 = vadd.f32 %v911_v50, %v1171_v28 }
  0xdc   :  { %v279_v54 = vpop.f32.mrf.mxu0 }
  0xdd   :  { %v408_v55 = vpack.c.bf16 %v379_v52, %v378_v51  ;;  %v280_v58 = vadd.f32 %v1171_v28, %v279_v54  ;;  %v384_v3 = vmax.f32 %v288_v60, 0.0 }
  0xde   :  { %v912_v57 = vpop.f32.mrf.mxu0 }
  0xdf   :  { %v291_v59 = vadd.f32 %v912_v57, %v1171_v28  ;;  %953 = vmatprep.mubr.bf16.mxu1 %v408_v55  ;;  %v382_v1 = vmax.f32 %v280_v58, 0.0 }
  0xe0   :  { %v282_v61 = vpop.f32.mrf.mxu0  ;;  %954 = vmatmul.mubr.bf16.gmra.mxu1 %v409_v56 }
  0xe1   :  { %v283_v62 = vadd.f32 %v1171_v28, %v282_v61  ;;  %v385_v63 = vmax.f32 %v291_v59, 0.0 }
  0xe2   :  { %v915_v0 = vpop.f32.mrf.mxu0 }
  0xe3   :  { %v383_v2 = vmax.f32 %v283_v62, 0.0  ;;  %v411_v6 = vpack.c.bf16 %v385_v63, %v384_v3  ;;  %v304_v10 = vadd.f32 %v915_v0, %v1171_v28 }
  0xe4   :  { %v295_v4 = vpop.f32.mrf.mxu0 }
  0xe5   :  { %v410_v5 = vpack.c.bf16 %v383_v2, %v382_v1  ;;  %v296_v8 = vadd.f32 %v1171_v28, %v295_v4  ;;  %v388_v17 = vmax.f32 %v304_v10, 0.0 }
  0xe6   :  { %v916_v7 = vpop.f32.mrf.mxu0 }
  0xe7   :  { %v307_v9 = vadd.f32 %v916_v7, %v1171_v28  ;;  %957 = vmatprep.mubr.bf16.mxu1 %v410_v5  ;;  %v386_v15 = vmax.f32 %v296_v8, 0.0 }
  0xe8   :  { %v298_v11 = vpop.f32.mrf.mxu0  ;;  %958 = vmatmul.mubr.bf16.gmra.mxu1 %v411_v6 }
  0xe9   :  { %v299_v12 = vadd.f32 %v1171_v28, %v298_v11  ;;  %v389_v13 = vmax.f32 %v307_v9, 0.0 }
  0xea   :  { %v919_v14 = vpop.f32.mrf.mxu0 }
  0xeb   :  { %v387_v16 = vmax.f32 %v299_v12, 0.0  ;;  %v413_v20 = vpack.c.bf16 %v389_v13, %v388_v17  ;;  %v320_v24 = vadd.f32 %v919_v14, %v1171_v28  ;;  %v1208_v12 = vld [vmem:[%s1290_s5] sm:$0xff]  }
  0xec   :  { %v311_v18 = vpop.f32.mrf.mxu0  ;;  %895 = vmatprep.mubr.bf16.mxu0 %v1208_v12 }
  0xed   :  { %v412_v19 = vpack.c.bf16 %v387_v16, %v386_v15  ;;  %v312_v22 = vadd.f32 %v1171_v28, %v311_v18  ;;  %v392_v32 = vmax.f32 %v320_v24, 0.0 }
  0xee   :  { %v920_v21 = vpop.f32.mrf.mxu0 }
  0xef   :  { %v323_v23 = vadd.f32 %v920_v21, %v1171_v28  ;;  %961 = vmatprep.mubr.bf16.mxu1 %v412_v19  ;;  %v390_v30 = vmax.f32 %v312_v22, 0.0 }
  0xf0   :  { %v314_v25 = vpop.f32.mrf.mxu0  ;;  %962 = vmatmul.mubr.bf16.gmra.mxu1 %v413_v20 }
  0xf1   :  { %v315_v26 = vadd.f32 %v1171_v28, %v314_v25  ;;  %v393_v27 = vmax.f32 %v323_v23, 0.0 }
  0xf2   :  { %v923_v29 = vpop.f32.mrf.mxu0 }
  0xf3   :  { %v391_v31 = vmax.f32 %v315_v26, 0.0  ;;  %v415_v35 = vpack.c.bf16 %v393_v27, %v392_v32  ;;  %v336_v39 = vadd.f32 %v923_v29, %v1171_v28 }
  0xf4   :  { %v327_v33 = vpop.f32.mrf.mxu0 }
  0xf5   :  { %v414_v34 = vpack.c.bf16 %v391_v31, %v390_v30  ;;  %v328_v37 = vadd.f32 %v1171_v28, %v327_v33  ;;  %v396_v46 = vmax.f32 %v336_v39, 0.0 }
  0xf6   :  { %v924_v36 = vpop.f32.mrf.mxu0 }
  0xf7   :  { %v339_v38 = vadd.f32 %v924_v36, %v1171_v28  ;;  %965 = vmatprep.mubr.bf16.mxu1 %v414_v34  ;;  %v394_v44 = vmax.f32 %v328_v37, 0.0 }
  0xf8   :  { %v330_v40 = vpop.f32.mrf.mxu0  ;;  %966 = vmatmul.mubr.bf16.gmra.mxu1 %v415_v35 }
  0xf9   :  { %v331_v41 = vadd.f32 %v1171_v28, %v330_v40  ;;  %v397_v42 = vmax.f32 %v339_v38, 0.0 }
  0xfa   :  { %v927_v43 = vpop.f32.mrf.mxu0 }
  0xfb   :  { %v395_v45 = vmax.f32 %v331_v41, 0.0  ;;  %v417_v49 = vpack.c.bf16 %v397_v42, %v396_v46  ;;  %v352_v53 = vadd.f32 %v927_v43, %v1171_v28 }
  0xfc   :  { %v343_v47 = vpop.f32.mrf.mxu0 }
  0xfd   :  { %v416_v48 = vpack.c.bf16 %v395_v45, %v394_v44  ;;  %v344_v51 = vadd.f32 %v1171_v28, %v343_v47  ;;  %v400_v60 = vmax.f32 %v352_v53, 0.0 }
  0xfe   :  { %v928_v50 = vpop.f32.mrf.mxu0 }
  0xff   :  { %v355_v52 = vadd.f32 %v928_v50, %v1171_v28  ;;  %969 = vmatprep.mubr.bf16.mxu1 %v416_v48  ;;  %v398_v58 = vmax.f32 %v344_v51, 0.0 }
 0x100   :  { %v346_v54 = vpop.f32.mrf.mxu0  ;;  %970 = vmatmul.mubr.bf16.gmra.mxu1 %v417_v49 }
 0x101   :  { %v347_v55 = vadd.f32 %v1171_v28, %v346_v54  ;;  %v401_v56 = vmax.f32 %v355_v52, 0.0 }
 0x102   :  { %v931_v57 = vpop.f32.mrf.mxu0 }
 0x103   :  { %v399_v59 = vmax.f32 %v347_v55, 0.0  ;;  %v419_v63 = vpack.c.bf16 %v401_v56, %v400_v60  ;;  %v368_v3 = vadd.f32 %v931_v57, %v1171_v28 }
 0x104   :  { %v359_v61 = vpop.f32.mrf.mxu0 }
 0x105   :  { %v418_v62 = vpack.c.bf16 %v399_v59, %v398_v58  ;;  %v360_v1 = vadd.f32 %v1171_v28, %v359_v61  ;;  %v404_v9 = vmax.f32 %v368_v3, 0.0 }
 0x106   :  { %v932_v0 = vpop.f32.mrf.mxu0 }
 0x107   :  { %v371_v2 = vadd.f32 %v932_v0, %v1171_v28  ;;  %973 = vmatprep.mubr.bf16.mxu1 %v418_v62  ;;  %v402_v7 = vmax.f32 %v360_v1, 0.0 }
 0x108   :  { %v362_v4 = vpop.f32.mrf.mxu0  ;;  %974 = vmatmul.mubr.bf16.gmra.mxu1 %v419_v63 }
 0x109   :  { %v363_v5 = vadd.f32 %v1171_v28, %v362_v4  ;;  %v405_v6 = vmax.f32 %v371_v2, 0.0  ;;  %v1214_v28 = vld [vmem:[%s1289_s4] ss:$0 sm:$0xff] }
 0x10b   :  { %v403_v8 = vmax.f32 %v363_v5, 0.0  ;;  %v421_v11 = vpack.c.bf16 %v405_v6, %v404_v9 }
 0x10d   :  { %v420_v10 = vpack.c.bf16 %v403_v8, %v402_v7 }
 0x10f   :  { %977 = vmatprep.mubr.bf16.mxu1 %v420_v10 }
 0x110   :  { %978 = vmatmul.mubr.bf16.gmra.mxu1 %v421_v11 }
 0x198   :  { %v951_v13 = vpop.f32.mrf.mxu1 }
 0x199   :  { %v536_v15 = vadd.f32 %v951_v13, %v1214_v28 }
 0x19a   :  { %v527_v14 = vpop.f32.mrf.mxu1 }
 0x19b   :  { %v528_v17 = vadd.f32 %v1214_v28, %v527_v14  ;;  %v656_v20 = vmax.f32 %v536_v15, 0.0 }
 0x19c   :  { %v952_v16 = vpop.f32.mrf.mxu1 }
 0x19d   :  { %v539_v18 = vadd.f32 %v952_v16, %v1214_v28  ;;  %v654_v24 = vmax.f32 %v528_v17, 0.0 }
 0x19e   :  { %v530_v19 = vpop.f32.mrf.mxu1 }
 0x19f   :  { %v657_v21 = vmax.f32 %v539_v18, 0.0  ;;  %v531_v22 = vadd.f32 %v1214_v28, %v530_v19 }
 0x1a0   :  { %v955_v23 = vpop.f32.mrf.mxu1 }
 0x1a1   :  { %v1220_v25 = vpack.c.bf16 %v657_v21, %v656_v20  ;;  %v655_v26 = vmax.f32 %v531_v22, 0.0  ;;  %v552_v30 = vadd.f32 %v955_v23, %v1214_v28 }
 0x1a2   :  { %v543_v27 = vpop.f32.mrf.mxu1 }
 0x1a3   :  { %v1222_v29 = vpack.c.bf16 %v655_v26, %v654_v24  ;;  %v544_v32 = vadd.f32 %v1214_v28, %v543_v27  ;;  %v660_v35 = vmax.f32 %v552_v30, 0.0 }
 0x1a4   :  { %v956_v31 = vpop.f32.mrf.mxu1 }
 0x1a5   :  { %v555_v33 = vadd.f32 %v956_v31, %v1214_v28  ;;  %v658_v39 = vmax.f32 %v544_v32, 0.0 }
 0x1a6   :  { %v546_v34 = vpop.f32.mrf.mxu1 }
 0x1a7   :  { %v661_v36 = vmax.f32 %v555_v33, 0.0  ;;  %v547_v37 = vadd.f32 %v1214_v28, %v546_v34 }
 0x1a8   :  { %v1228_v38 = vpop.f32.mrf.mxu1 }
 0x1a9   :  { %v1230_v40 = vpack.c.bf16 %v661_v36, %v660_v35  ;;  %v659_v41 = vmax.f32 %v547_v37, 0.0 }
 0x1aa   :  { %v1232_v42 = vpop.f32.mrf.mxu1 }
 0x1ab   :  { %v1234_v43 = vpack.c.bf16 %v659_v41, %v658_v39 }
 0x1ac   :  { %v960_v44 = vpop.f32.mrf.mxu1 }
 0x1ad   :  { %v571_v41 = vadd.f32 %v960_v44, %v1214_v28 }
 0x1ae   :  { %v1236_v45 = vpop.f32.mrf.mxu1 }
 0x1b0   :  { %v963_v46 = vpop.f32.mrf.mxu1 }
 0x1b1   :  { %v584_v13 = vadd.f32 %v963_v46, %v1214_v28 }
 0x1b2   :  { %v575_v47 = vpop.f32.mrf.mxu1 }
 0x1b3   :  { %v668_v22 = vmax.f32 %v584_v13, 0.0  ;;  %v576_v33 = vadd.f32 %v1214_v28, %v575_v47 }
 0x1b4   :  { %v964_v48 = vpop.f32.mrf.mxu1 }
 0x1b5   :  { %v587_v9 = vadd.f32 %v964_v48, %v1214_v28  ;;  %v666_v37 = vmax.f32 %v576_v33, 0.0 }
 0x1b6   :  { %v578_v49 = vpop.f32.mrf.mxu1 }
 0x1b7   :  { %v669_v17 = vmax.f32 %v587_v9, 0.0  ;;  %v579_v30 = vadd.f32 %v1214_v28, %v578_v49 }
 0x1b8   :  { %v967_v50 = vpop.f32.mrf.mxu1 }
 0x1b9   :  { %v600_v52 = vadd.f32 %v967_v50, %v1214_v28  ;;  %v693_v27 = vpack.c.bf16 %v669_v17, %v668_v22  ;;  %v667_v35 = vmax.f32 %v579_v30, 0.0  ;;  %v568_v50 = vadd.f32 %v1228_v38, %v1214_v28 }
 0x1ba   :  { %v591_v51 = vpop.f32.mrf.mxu1 }
 0x1bb   :  { %v592_v54 = vadd.f32 %v1214_v28, %v591_v51  ;;  %v672_v57 = vmax.f32 %v600_v52, 0.0  ;;  %v692_v46 = vpack.c.bf16 %v667_v35, %v666_v37  ;;  %v665_v51 = vmax.f32 %v571_v41, 0.0 }
 0x1bc   :  { %v968_v53 = vpop.f32.mrf.mxu1 }
 0x1bd   :  { %v603_v55 = vadd.f32 %v968_v53, %v1214_v28  ;;  %v670_v61 = vmax.f32 %v592_v54, 0.0  ;;  %v664_v53 = vmax.f32 %v568_v50, 0.0 }
 0x1be   :  { %v594_v56 = vpop.f32.mrf.mxu1 }
 0x1bf   :  { %v673_v58 = vmax.f32 %v603_v55, 0.0  ;;  %v595_v59 = vadd.f32 %v1214_v28, %v594_v56  ;;  %v691_v55 = vpack.c.bf16 %v665_v51, %v664_v53  ;;  %v563_v56 = vadd.f32 %v1214_v28, %v1236_v45 }
 0x1c0   :  { %v971_v60 = vpop.f32.mrf.mxu1 }
 0x1c1   :  { %v1242_v62 = vpack.c.bf16 %v673_v58, %v672_v57  ;;  %v671_v63 = vmax.f32 %v595_v59, 0.0  ;;  %v560_v58 = vadd.f32 %v1214_v28, %v1232_v42  ;;  %v616_v38 = vadd.f32 %v971_v60, %v1214_v28 }
 0x1c2   :  { %v1244_v0 = vpop.f32.mrf.mxu1  ;;  %v663_v59 = vmax.f32 %v563_v56, 0.0 }
 0x1c3   :  { %v1246_v1 = vpack.c.bf16 %v671_v63, %v670_v61  ;;  %v662_v63 = vmax.f32 %v560_v58, 0.0  ;;  %v608_v45 = vadd.f32 %v1214_v28, %v1244_v0  ;;  %v761_v0 = vlaneseq }
 0x1c4   :  { %v972_v2 = vpop.f32.mrf.mxu1 }
 0x1c5   :  { %v619_v44 = vadd.f32 %v972_v2, %v1214_v28  ;;  %v762_v9 = vshrl.u32 %v761_v0, 7  ;;  %vm775_vm1 = vcmp.lt.s32.totalorder %v761_v0, 256 }
 0x1c6   :  { %v610_v3 = vpop.f32.mrf.mxu1 }
 0x1c7   :  { %v677_v61 = vmax.f32 %v619_v44, 0.0 }
 0x1c8   :  { %v975_v4 = vpop.f32.mrf.mxu1 }
 0x1c9   :  { %v632_v34 = vadd.f32 %v975_v4, %v1214_v28  ;;  %v676_v4 = vmax.f32 %v616_v38, 0.0 }
 0x1ca   :  { %v623_v5 = vpop.f32.mrf.mxu1 }
 0x1cb   :  { %v680_v39 = vmax.f32 %v632_v34, 0.0  ;;  %v624_v47 = vadd.f32 %v1214_v28, %v623_v5  ;;  %v690_v5 = vpack.c.bf16 %v663_v59, %v662_v63 }
 0x1cc   :  { %v976_v6 = vpop.f32.mrf.mxu1 }
 0x1cd   :  { %v635_v31 = vadd.f32 %v976_v6, %v1214_v28  ;;  %v678_v54 = vmax.f32 %v624_v47, 0.0  ;;  %v697_v6 = vpack.c.bf16 %v677_v61, %v676_v4 }
 0x1ce   :  { %v626_v7 = vpop.f32.mrf.mxu1 }
 0x1cf   :  { %v681_v36 = vmax.f32 %v635_v31, 0.0  ;;  %v627_v49 = vadd.f32 %v1214_v28, %v626_v7  ;;  %v611_v7 = vadd.f32 %v1214_v28, %v610_v3 }
 0x1d0   :  { %v979_v8 = vpop.f32.mrf.mxu1 }
 0x1d1   :  { %v648_v11 = vadd.f32 %v979_v8, %v1214_v28  ;;  %v699_v48 = vpack.c.bf16 %v681_v36, %v680_v39  ;;  %v679_v52 = vmax.f32 %v627_v49, 0.0  ;;  %v675_v2 = vmax.f32 %v611_v7, 0.0 }
 0x1d2   :  { %v639_v10 = vpop.f32.mrf.mxu1  ;;  %v674_v8 = vmax.f32 %v608_v45, 0.0 }
 0x1d3   :  { %v640_v15 = vadd.f32 %v1214_v28, %v639_v10  ;;  %v684_v19 = vmax.f32 %v648_v11, 0.0  ;;  %v698_v57 = vpack.c.bf16 %v679_v52, %v678_v54 }
 0x1d4   :  { %v980_v14 = vpop.f32.mrf.mxu1  ;;  %v696_v42 = vpack.c.bf16 %v675_v2, %v674_v8 }
 0x1d5   :  { %v651_v16 = vadd.f32 %v980_v14, %v1214_v28  ;;  %v682_v23 = vmax.f32 %v640_v15, 0.0 }
 0x1d6   :  { %v642_v18 = vpop.f32.mrf.mxu1 }
 0x1d7   :  { %v685_v20 = vmax.f32 %v651_v16, 0.0  ;;  %v643_v21 = vadd.f32 %v1214_v28, %v642_v18  ;;  %v1032_v28 = vmov 1966171168  }
 0x1d8   :  { %v759_v60 = vunpack.c.l.s4 %v1032_v28 }
 0x1d9   :  { %v701_v24 = vpack.c.bf16 %v685_v20, %v684_v19  ;;  %v683_v26 = vmax.f32 %v643_v21, 0.0 }
 0x1da   :  { %v760_v3 = vunpack.c.0.s8 %v759_v60 }
 0x1db   :  { %v700_v32 = vpack.c.bf16 %v683_v26, %v682_v23  ;;  %879 = vmatprep.subr.bf16.mxu0 %v701_v24 }
 0x1dc   :  { %880 = vmatpush3.bf16.xpose.msra.mxu0 %v693_v27 }
 0x1dd   :  { %881 = vmatprep.subr.bf16.mxu0 %v700_v32 }
 0x1e4   :  { %882 = vmatpush3.bf16.xpose.msra.mxu0 %v692_v46 }
 0x1e5   :  { %883 = vmatprep.subr.bf16.mxu0 %v699_v48 }
 0x1ec   :  { %884 = vmatpush3.bf16.xpose.msra.mxu0 %v691_v55 }
 0x1ed   :  { %885 = vmatprep.subr.bf16.mxu0 %v698_v57 }
 0x1f4   :  { %886 = vmatpush3.bf16.xpose.msra.mxu0 %v690_v5 }
 0x1f5   :  { %887 = vmatprep.subr.bf16.mxu0 %v697_v6 }
 0x1fc   :  { %888 = vmatpush3.bf16.xpose.msra.mxu0 %v1230_v40  ;;  %v752_v40 = vstv %s1291_s6 }
 0x1fd   :  { %889 = vmatprep.subr.bf16.mxu0 %v696_v42 }
 0x204   :  { %890 = vmatpush3.bf16.xpose.msra.mxu0 %v1234_v43 }
 0x205   :  { %891 = vmatprep.subr.bf16.mxu0 %v1242_v62 }
 0x20c   :  { %892 = vmatpush3.bf16.xpose.msra.mxu0 %v1220_v25  ;;  %v763_v25 = vsub.s32 %v760_v3, %v762_v9 }
 0x20d   :  { %893 = vmatprep.subr.bf16.mxu0 %v1246_v1 }
 0x214   :  { %894 = vmatpush3.bf16.xpose.msra.mxu0 %v1222_v29 }
 0x21b   :  { %896 = vmatmul.mubr.bf16.vlgmr.msra.gmra.mxu0 %v1208_v12 }
 0x2db   :  { %v744_v10 = vpop.f32.mrf.mxu0 }
 0x2dc   :  { %v753_v62 = vadd.f32 %v752_v40, %v744_v10 }
 0x2dd   :  { %v746_v43 = vpop.f32.mrf.mxu0 }
 0x2de   :  { %v754_v11 = vadd.f32 %v752_v40, %v746_v43 }
 0x2df   :  { %v748_v13 = vpop.f32.mrf.mxu0 }
 0x2e0   :  { %v757_v1 = vcombine.low %v753_v62, %v754_v11 }
 0x2e1   :  { %v749_v14 = vpop.f32.mrf.mxu0 }
 0x2e2   :  { %v764_v12 = vrot.slane %v757_v1, %v763_v25 }
 0x2e4   :  { %v771_v29 = vrot.slane %v764_v12, %v763_v25 }
 0x2e6   :  { %777 = vst.msk [vmem:[#allocation3] sm:$0x3] %vm775_vm1, %v771_v29 }
 0x2e7   :  { %1021 = shalt.err (!%p1018_p4)
}
 0x2e8   :  { %787 = dma.vmem_to_hbm [thread:$0]  %s785_s9, 32, %s1292_s7, [#allocation4]  }
 0x2e9   :  { %1030 = dma.done.wait [#allocation4], 32  }
 0x2ea   :  { %1031 = vsyncadd [#allocation4], 4294967264 }
 0x2eb   :  { %791 = vsyncpa [#allocation4], 1 }

</bundles_post_ra>
